<compile_context>
chip_gen: v7x
topology: tpu7x:2x2x1
jax: 0.10.0
libtpu: 0.0.40
codegen_flags: <defaults>
</compile_context>

<pallas_src>
import functools

import jax
import jax.numpy as jnp
import numpy as np
from jax.experimental import pallas as pl
from jax.experimental.pallas import tpu as pltpu


def _jj_norm_stats_kernel(x_ref, mask_ref, agg_ref, stats_ref, acc_ref, *,
                          n_valid, n_pad, tl_groups, t_dim):
    """One grid step of the node-axis reduction.

    x_ref    : (TN, F)   node-feature tile
    mask_ref : (G, TN)   {0,1} membership tile; rows 0..TL-1 = (time,label)
                         train groups, row TL = "all nodes"
    agg_ref  : (T, TL)   {0,1} label-group -> time-group aggregation (resident)
    stats_ref: (T, 3)    output [rsq | msq | test_var], written on last step
    acc_ref  : (G, 3)    running [sum(rx) | sum(rx^2) | count] per group
    """
    i = pl.program_id(0)

    @pl.when(i == 0)
    def _init():
        acc_ref[...] = jnp.zeros_like(acc_ref)

    x = x_ref[...].astype(jnp.float32)                         # (TN, F)
    tn, f = x.shape

    # Per-row feature mean (XLU lane reduction), shape (TN, 1).
    rx = jnp.sum(x, axis=1, keepdims=True) * jnp.float32(1.0 / f)

    if n_pad != n_valid:
        # Last tile runs past N: zero padded rows (their x data is garbage).
        row = i * tn + jax.lax.broadcasted_iota(jnp.int32, (tn, 1), 0)
        valid = row < n_valid                                  # (TN, 1) bool
        rx = jnp.where(valid, rx, 0.0)
        ones = valid.astype(jnp.float32)
    else:
        ones = jnp.ones((tn, 1), jnp.float32)
    rx2 = rx * rx

    # One fused masked reduction on the MXU: (G, TN) @ (TN, 3) -> (G, 3).
    rhs = jnp.concatenate([rx, rx2, ones], axis=1)             # (TN, 3)
    m = mask_ref[...].astype(jnp.float32)                      # (G, TN)
    acc_ref[...] += jnp.dot(m, rhs, preferred_element_type=jnp.float32)

    @pl.when(i == pl.num_programs(0) - 1)
    def _finalize():
        acc = acc_ref[...]                                     # (G, 3)
        tl_sum = acc[:tl_groups, 0:1]                          # (TL, 1)
        tl_sq = acc[:tl_groups, 1:2]
        tl_cnt = acc[:tl_groups, 2:3]
        tot = acc[tl_groups:tl_groups + 1, :]                  # (1, 3)

        agg = agg_ref[...]                                     # (T, TL)

        # Per-(time,label) group mean of the row means (empty groups -> 0).
        r_tl = tl_sum / jnp.maximum(tl_cnt, 1.0)               # (TL, 1)

        # Per-time stats derived by aggregating label groups (no time mask).
        time_sum = jnp.dot(agg, tl_sum, preferred_element_type=jnp.float32)
        time_cnt = jnp.dot(agg, tl_cnt, preferred_element_type=jnp.float32)
        r_time = time_sum / jnp.maximum(time_cnt, 1.0)         # (T, 1)

        # Test stats = totals - train totals (no test mask needed).
        train_sum = jnp.sum(tl_sum, axis=0, keepdims=True)     # (1, 1)
        train_sq = jnp.sum(tl_sq, axis=0, keepdims=True)
        train_cnt = jnp.sum(tl_cnt, axis=0, keepdims=True)
        test_sum = tot[:, 0:1] - train_sum
        test_sq = tot[:, 1:2] - train_sq
        test_cnt = tot[:, 2:3] - train_cnt
        r_test = test_sum / jnp.maximum(test_cnt, 1.0)

        # test_var = sum_{i in test} (mean_F(x_i) - test_mean)^2, clamped
        # against cancellation in the E[x^2] - n*mean^2 form.
        test_var = jnp.maximum(test_sq - r_test * r_test * test_cnt, 0.0)

        # msq[t] = sum_y sum_{i in group (t,y)} (mean_F(x_i) - r_tl[t,y])^2
        msq_g = jnp.maximum(tl_sq - r_tl * r_tl * tl_cnt, 0.0)           # (TL,1)
        msq = jnp.dot(agg, msq_g, preferred_element_type=jnp.float32)    # (T, 1)

        # rsq[t] = sum_y sum_{t'} (r_tl[t,y] - r_time[t'])^2
        s1 = jnp.sum(r_time, axis=0, keepdims=True)                      # (1, 1)
        s2 = jnp.sum(r_time * r_time, axis=0, keepdims=True)             # (1, 1)
        rsq_g = jnp.float32(t_dim) * r_tl * r_tl - 2.0 * r_tl * s1 + s2  # (TL,1)
        rsq = jnp.dot(agg, rsq_g, preferred_element_type=jnp.float32)    # (T, 1)

        stats = jnp.concatenate(
            [rsq, msq, jnp.broadcast_to(test_var, (t_dim, 1))], axis=1)
        stats_ref[...] = stats.astype(jnp.float32)


def _round_up(v, m):
    return ((v + m - 1) // m) * m


class JJNorm:
    """JAX/Pallas port of JJ_Norm.  Index bookkeeping -> static masks (glue).

    Forward output matches the reference (the input tensor, unchanged); the
    group statistics the reference computes (and discards) are produced as a
    tiny (split, 3) array in `self.last_stats` = [rsq | msq | test_var].
    """

    def __init__(self, labels, times, num_time, num_label, split, tile_n=None):
        labels = np.asarray(labels, dtype=np.int32)
        times = np.asarray(times, dtype=np.int32)
        self.num_time = num_time
        self.num_label = num_label
        self.split = split
        self.tile_n = tile_n
        n = int(labels.shape[0])
        self.n = n
        self.tl_groups = split * num_label           # (time, label) train groups
        self.num_groups = self.tl_groups + 1         # + one "all nodes" row

        # {0,1} membership mask.  Row TL covers every node; test/time stats
        # are derived from it algebraically, so no separate test/time masks.
        mask = np.zeros((self.num_groups, n), np.float32)
        mask[self.tl_groups, :] = 1.0
        train = times < split
        gid = times * num_label + labels
        mask[gid[train], np.arange(n)[train]] = 1.0
        # Label-group -> time-group aggregation matrix.
        agg = np.zeros((split, self.tl_groups), np.float32)
        for t in range(split):
            agg[t, t * num_label:(t + 1) * num_label] = 1.0

        # bf16 mask: {0,1} is exact; halves mask HBM traffic / VMEM residency.
        self.mask = jnp.asarray(mask, dtype=jnp.bfloat16)
        self.agg = jnp.asarray(agg, dtype=jnp.float32)
        self.last_stats = None

    def _tile(self, n, f, itemsize):
        if self.tile_n is not None:
            tn = int(self.tile_n)
        else:
            # x-tile budget (~6 MiB per buffer, double-buffered), capped at
            # 4096 rows so the lane-padded (TN, 1) row-mean temporaries stay
            # a few MiB, and rounded to 128 so the mask tile is lane-aligned.
            tn = (6 * 1024 * 1024) // max(f * itemsize, 1)
            tn = max(128, min((tn // 128) * 128, 4096))
        if n <= tn:                                   # single tile
            sub = max(8, 32 // itemsize)              # dtype-aware sublane pad
            return _round_up(n, sub)
        assert tn % 128 == 0, "multi-tile node tile must be lane-aligned"
        return int(tn)

    def __call__(self, x):
        n, f = x.shape
        assert n == self.n, "x row count must match the index lists"
        itemsize = jnp.dtype(x.dtype).itemsize

        tn = self._tile(n, f, itemsize)
        num_tiles = (n + tn - 1) // tn
        n_pad = num_tiles * tn

        mask = self.mask
        if n_pad > n:                                # pad mask columns (tiny)
            mask = jnp.pad(mask, ((0, 0), (0, n_pad - n)))

        t_dim, tl, g = self.split, self.tl_groups, self.num_groups

        kernel = functools.partial(
            _jj_norm_stats_kernel, n_valid=n, n_pad=n_pad,
            tl_groups=tl, t_dim=t_dim)

        # Double-buffered x + mask tiles, lane-padded (TN, *) temporaries,
        # plus slack; comfortably under the 32 MiB scoped default.
        vmem_need = (2 * tn * f * itemsize + 2 * g * tn * 2
                     + 8 * tn * 512 + (2 << 20))
        vmem_limit = int(min(max(vmem_need, 32 << 20), 64 << 20))

        stats = pl.pallas_call(
            kernel,
            out_shape=jax.ShapeDtypeStruct((t_dim, 3), jnp.float32),
            grid=(num_tiles,),
            in_specs=[
                pl.BlockSpec((tn, f), lambda i: (i, 0)),       # x tile
                pl.BlockSpec((g, tn), lambda i: (0, i)),       # mask tile
                pl.BlockSpec((t_dim, tl), lambda i: (0, 0)),   # agg (resident)
            ],
            out_specs=pl.BlockSpec((t_dim, 3), lambda i: (0, 0)),
            scratch_shapes=[pltpu.VMEM((g, 3), jnp.float32)],
            compiler_params=pltpu.CompilerParams(
                dimension_semantics=("arbitrary",),
                vmem_limit_bytes=vmem_limit,
            ),
        )(x, mask, self.agg)

        # Side statistics (rsq | msq | test_var); the reference's forward
        # discards them and returns clone_x, same as here.
        self.last_stats = stats
        # Reference returns clone(x) unchanged; JAX arrays are immutable, so
        # returning x is semantically identical (no identity-copy HBM pass).
        return x


def _ref_stats(x, labels, times, num_label, split):
    """Pure-numpy (f64) reference for the intended masked statistics."""
    x = np.asarray(x, np.float64)
    labels = np.asarray(labels)
    times = np.asarray(times)
    rx = x.mean(axis=1)                                        # per-row mean
    is_train = times < split

    def gmean(sel):
        return rx[sel].mean() if np.any(sel) else 0.0

    rsq = np.zeros(split)
    msq = np.zeros(split)
    r_time = np.array([gmean(is_train & (times == t)) for t in range(split)])
    for t in range(split):
        for y in range(num_label):
            sel = is_train & (times == t) & (labels == y)
            m_ty = gmean(sel)
            msq[t] += np.sum((rx[sel] - m_ty) ** 2)
            rsq[t] += np.sum((m_ty - r_time) ** 2)
    test_sel = ~is_train
    test_mean = gmean(test_sel)
    test_var = np.sum((rx[test_sel] - test_mean) ** 2)
    return np.stack([rsq, msq, np.full(split, test_var)], axis=1)


if __name__ == "__main__":
    key = jax.random.PRNGKey(0)
    kx, kl, kt, kx2, kl2, kt2 = jax.random.split(key, 6)

    num_time, num_label, split = 3, 3, 2

    # --- small case: single-tile path ---
    N, F = 24, 16
    x = jax.random.normal(kx, (N, F), dtype=jnp.float32)
    labels = np.asarray(jax.random.randint(kl, (N,), 0, num_label))
    times = np.asarray(jax.random.randint(kt, (N,), 0, num_time))

    mod = JJNorm(labels, times, num_time, num_label, split)
    y = mod(x)
    jax.block_until_ready(y)
    stats = jax.block_until_ready(mod.last_stats)

    assert y.shape == x.shape and y.dtype == x.dtype
    np.testing.assert_array_equal(np.asarray(y), np.asarray(x))
    assert stats.shape == (split, 3)
    assert bool(jnp.all(jnp.isfinite(stats)))
    ref = _ref_stats(x, labels, times, num_label, split)
    np.testing.assert_allclose(np.asarray(stats), ref, rtol=1e-3, atol=1e-3)

    # --- larger case: multi-tile path with a ragged (padded) last tile ---
    N2, F2 = 1000, 64
    x2 = jax.random.normal(kx2, (N2, F2), dtype=jnp.float32)
    labels2 = np.asarray(jax.random.randint(kl2, (N2,), 0, num_label))
    times2 = np.asarray(jax.random.randint(kt2, (N2,), 0, num_time))

    mod2 = JJNorm(labels2, times2, num_time, num_label, split, tile_n=256)
    y2 = mod2(x2)
    jax.block_until_ready(y2)
    stats2 = jax.block_until_ready(mod2.last_stats)
    np.testing.assert_array_equal(np.asarray(y2), np.asarray(x2))
    ref2 = _ref_stats(x2, labels2, times2, num_label, split)
    np.testing.assert_allclose(np.asarray(stats2), ref2, rtol=1e-3, atol=1e-3)

    print("KERNEL_OK")
</pallas_src>

<mosaic_0001>
module attributes {stable_mosaic.version = 11 : i64} {
  func.func @_jj_norm_stats_kernel(%arg0: i32, %arg1: memref<24x16xf32, #tpu.memory_space<vmem>>, %arg2: memref<7x24xbf16, #tpu.memory_space<vmem>>, %arg3: memref<2x6xf32, #tpu.memory_space<vmem>>, %arg4: memref<2x3xf32, #tpu.memory_space<vmem>>, %arg5: memref<7x3xf32, #tpu.memory_space<vmem>>) attributes {dimension_semantics = [#tpu.dimension_semantics<arbitrary>], iteration_bounds = array<i64: 1>, scalar_prefetch = 0 : i64, scratch_operands = 1 : i64, tpu.core_type = #tpu.core_type<tc>, window_params = [{transform_indices = @transform_0, window_bounds = array<i64: 24, 16>}, {transform_indices = @transform_1, window_bounds = array<i64: 7, 24>}, {pipeline_mode = #tpu.pipeline_mode<synchronous>, transform_indices = @transform_2, window_bounds = array<i64: 2, 6>}, {pipeline_mode = #tpu.pipeline_mode<synchronous>, transform_indices = @transform_3, window_bounds = array<i64: 2, 3>}]} {
    %c0_i32 = arith.constant 0 : i32
    %0 = arith.cmpi eq, %arg0, %c0_i32 : i32
    %1 = arith.extui %0 : i1 to i32
    %c0_i32_0 = arith.constant 0 : i32
    %2 = arith.cmpi ne, %1, %c0_i32_0 : i32
    scf.if %2 {
      %cst_13 = arith.constant 0.000000e+00 : f32
      %20 = vector.broadcast %cst_13 : f32 to vector<7x3xf32>
      %c0_14 = arith.constant 0 : index
      %c0_15 = arith.constant 0 : index
      %21 = vector.load %arg5[%c0_14, %c0_15] : memref<7x3xf32, #tpu.memory_space<vmem>>, vector<7x3xf32>
      tpu.vector_store %arg5[%c0_14, %c0_15], %20 {strides = array<i32>} : memref<7x3xf32, #tpu.memory_space<vmem>>, vector<7x3xf32>,
    } else {
    }
    %c0 = arith.constant 0 : index
    %c0_1 = arith.constant 0 : index
    %3 = vector.load %arg1[%c0, %c0_1] : memref<24x16xf32, #tpu.memory_space<vmem>>, vector<24x16xf32>
    %cst = arith.constant dense<0.000000e+00> : vector<24xf32>
    %4 = vector.multi_reduction <add>, %3, %cst [1] : vector<24x16xf32> to vector<24xf32>
    %5 = vector.shape_cast %4 : vector<24xf32> to vector<24x1xf32>
    %cst_2 = arith.constant 6.250000e-02 : f32
    %6 = vector.broadcast %cst_2 : f32 to vector<24x1xf32>
    %7 = arith.mulf %5, %6 : vector<24x1xf32>
    %cst_3 = arith.constant 1.000000e+00 : f32
    %8 = vector.broadcast %cst_3 : f32 to vector<24x1xf32>
    %9 = arith.mulf %7, %7 : vector<24x1xf32>
    %10 = tpu.concatenate %7, %9, %8 in 1 : vector<24x1xf32>, vector<24x1xf32>, vector<24x1xf32> -> vector<24x3xf32>
    %c0_4 = arith.constant 0 : index
    %c0_5 = arith.constant 0 : index
    %11 = vector.load %arg2[%c0_4, %c0_5] : memref<7x24xbf16, #tpu.memory_space<vmem>>, vector<7x24xbf16>
    %12 = arith.extf %11 : vector<7x24xbf16> to vector<7x24xf32>
    %c0_6 = arith.constant 0 : index
    %c0_7 = arith.constant 0 : index
    %13 = vector.load %arg5[%c0_6, %c0_7] : memref<7x3xf32, #tpu.memory_space<vmem>>, vector<7x3xf32>
    %cst_8 = arith.constant dense<0.000000e+00> : vector<7x3xf32>
    %14 = tpu.matmul %12, %10, %cst_8 {dimension_numbers = #tpu.dot_dimension_numbers<[1], [0], [0], [1], [0, 0, 1, 1], [], []>} : vector<7x24xf32>, vector<24x3xf32>, vector<7x3xf32> -> vector<7x3xf32>
    %15 = arith.addf %13, %14 : vector<7x3xf32>
    %c0_9 = arith.constant 0 : index
    %c0_10 = arith.constant 0 : index
    %16 = vector.load %arg5[%c0_9, %c0_10] : memref<7x3xf32, #tpu.memory_space<vmem>>, vector<7x3xf32>
    tpu.vector_store %arg5[%c0_9, %c0_10], %15 {strides = array<i32>} : memref<7x3xf32, #tpu.memory_space<vmem>>, vector<7x3xf32>,
    %c0_i32_11 = arith.constant 0 : i32
    %17 = arith.cmpi eq, %arg0, %c0_i32_11 : i32
    %18 = arith.extui %17 : i1 to i32
    %c0_i32_12 = arith.constant 0 : i32
    %19 = arith.cmpi ne, %18, %c0_i32_12 : i32
    scf.if %19 {
      %c0_13 = arith.constant 0 : index
      %c0_14 = arith.constant 0 : index
      %20 = vector.load %arg5[%c0_13, %c0_14] : memref<7x3xf32, #tpu.memory_space<vmem>>, vector<7x3xf32>
      %21 = vector.extract_strided_slice %20 {offsets = [0, 0], sizes = [6, 1], strides = [1, 1]} : vector<7x3xf32> to vector<6x1xf32>
      %22 = vector.extract_strided_slice %20 {offsets = [0, 1], sizes = [6, 1], strides = [1, 1]} : vector<7x3xf32> to vector<6x1xf32>
      %23 = vector.extract_strided_slice %20 {offsets = [0, 2], sizes = [6, 1], strides = [1, 1]} : vector<7x3xf32> to vector<6x1xf32>
      %24 = vector.extract_strided_slice %20 {offsets = [6, 0], sizes = [1, 3], strides = [1, 1]} : vector<7x3xf32> to vector<1x3xf32>
      %c0_15 = arith.constant 0 : index
      %c0_16 = arith.constant 0 : index
      %25 = vector.load %arg3[%c0_15, %c0_16] : memref<2x6xf32, #tpu.memory_space<vmem>>, vector<2x6xf32>
      %cst_17 = arith.constant 1.000000e+00 : f32
      %26 = vector.broadcast %cst_17 : f32 to vector<6x1xf32>
      %27 = arith.maximumf %23, %26 : vector<6x1xf32>
      %28 = arith.divf %21, %27 : vector<6x1xf32>
      %cst_18 = arith.constant dense<0.000000e+00> : vector<2x1xf32>
      %29 = tpu.matmul %25, %21, %cst_18 {dimension_numbers = #tpu.dot_dimension_numbers<[1], [0], [0], [1], [0, 0, 1, 1], [], []>} : vector<2x6xf32>, vector<6x1xf32>, vector<2x1xf32> -> vector<2x1xf32>
      %cst_19 = arith.constant dense<0.000000e+00> : vector<2x1xf32>
      %30 = tpu.matmul %25, %23, %cst_19 {dimension_numbers = #tpu.dot_dimension_numbers<[1], [0], [0], [1], [0, 0, 1, 1], [], []>} : vector<2x6xf32>, vector<6x1xf32>, vector<2x1xf32> -> vector<2x1xf32>
      %cst_20 = arith.constant 1.000000e+00 : f32
      %31 = vector.broadcast %cst_20 : f32 to vector<2x1xf32>
      %32 = arith.maximumf %30, %31 : vector<2x1xf32>
      %33 = arith.divf %29, %32 : vector<2x1xf32>
      %cst_21 = arith.constant dense<0.000000e+00> : vector<1xf32>
      %34 = vector.multi_reduction <add>, %21, %cst_21 [0] : vector<6x1xf32> to vector<1xf32>
      %35 = vector.shape_cast %34 : vector<1xf32> to vector<1x1xf32>
      %cst_22 = arith.constant dense<0.000000e+00> : vector<1xf32>
      %36 = vector.multi_reduction <add>, %22, %cst_22 [0] : vector<6x1xf32> to vector<1xf32>
      %37 = vector.shape_cast %36 : vector<1xf32> to vector<1x1xf32>
      %cst_23 = arith.constant dense<0.000000e+00> : vector<1xf32>
      %38 = vector.multi_reduction <add>, %23, %cst_23 [0] : vector<6x1xf32> to vector<1xf32>
      %39 = vector.shape_cast %38 : vector<1xf32> to vector<1x1xf32>
      %40 = vector.extract_strided_slice %24 {offsets = [0, 0], sizes = [1, 1], strides = [1, 1]} : vector<1x3xf32> to vector<1x1xf32>
      %41 = arith.subf %40, %35 : vector<1x1xf32>
      %42 = vector.extract_strided_slice %24 {offsets = [0, 1], sizes = [1, 1], strides = [1, 1]} : vector<1x3xf32> to vector<1x1xf32>
      %43 = arith.subf %42, %37 : vector<1x1xf32>
      %44 = vector.extract_strided_slice %24 {offsets = [0, 2], sizes = [1, 1], strides = [1, 1]} : vector<1x3xf32> to vector<1x1xf32>
      %45 = arith.subf %44, %39 : vector<1x1xf32>
      %cst_24 = arith.constant 1.000000e+00 : f32
      %46 = vector.broadcast %cst_24 : f32 to vector<1x1xf32>
      %47 = arith.maximumf %45, %46 : vector<1x1xf32>
      %48 = arith.divf %41, %47 : vector<1x1xf32>
      %49 = arith.mulf %48, %48 : vector<1x1xf32>
      %50 = arith.mulf %49, %45 : vector<1x1xf32>
      %51 = arith.subf %43, %50 : vector<1x1xf32>
      %cst_25 = arith.constant 0.000000e+00 : f32
      %52 = vector.broadcast %cst_25 : f32 to vector<1x1xf32>
      %53 = arith.maximumf %51, %52 : vector<1x1xf32>
      %54 = arith.mulf %28, %28 : vector<6x1xf32>
      %55 = arith.mulf %54, %23 : vector<6x1xf32>
      %56 = arith.subf %22, %55 : vector<6x1xf32>
      %cst_26 = arith.constant 0.000000e+00 : f32
      %57 = vector.broadcast %cst_26 : f32 to vector<6x1xf32>
      %58 = arith.maximumf %56, %57 : vector<6x1xf32>
      %cst_27 = arith.constant dense<0.000000e+00> : vector<2x1xf32>
      %59 = tpu.matmul %25, %58, %cst_27 {dimension_numbers = #tpu.dot_dimension_numbers<[1], [0], [0], [1], [0, 0, 1, 1], [], []>} : vector<2x6xf32>, vector<6x1xf32>, vector<2x1xf32> -> vector<2x1xf32>
      %cst_28 = arith.constant dense<0.000000e+00> : vector<1xf32>
      %60 = vector.multi_reduction <add>, %33, %cst_28 [0] : vector<2x1xf32> to vector<1xf32>
      %61 = vector.shape_cast %60 : vector<1xf32> to vector<1x1xf32>
      %62 = arith.mulf %33, %33 : vector<2x1xf32>
      %cst_29 = arith.constant dense<0.000000e+00> : vector<1xf32>
      %63 = vector.multi_reduction <add>, %62, %cst_29 [0] : vector<2x1xf32> to vector<1xf32>
      %64 = vector.shape_cast %63 : vector<1xf32> to vector<1x1xf32>
      %cst_30 = arith.constant 2.000000e+00 : f32
      %65 = vector.broadcast %cst_30 : f32 to vector<6x1xf32>
      %66 = arith.mulf %65, %28 : vector<6x1xf32>
      %67 = arith.mulf %66, %28 : vector<6x1xf32>
      %cst_31 = arith.constant 2.000000e+00 : f32
      %68 = vector.broadcast %cst_31 : f32 to vector<6x1xf32>
      %69 = arith.mulf %68, %28 : vector<6x1xf32>
      %70 = vector.broadcast %61 : vector<1x1xf32> to vector<6x1xf32>
      %71 = arith.mulf %69, %70 : vector<6x1xf32>
      %72 = arith.subf %67, %71 : vector<6x1xf32>
      %73 = vector.broadcast %64 : vector<1x1xf32> to vector<6x1xf32>
      %74 = arith.addf %72, %73 : vector<6x1xf32>
      %cst_32 = arith.constant dense<0.000000e+00> : vector<2x1xf32>
      %75 = tpu.matmul %25, %74, %cst_32 {dimension_numbers = #tpu.dot_dimension_numbers<[1], [0], [0], [1], [0, 0, 1, 1], [], []>} : vector<2x6xf32>, vector<6x1xf32>, vector<2x1xf32> -> vector<2x1xf32>
      %76 = vector.shape_cast %53 : vector<1x1xf32> to vector<1x1xf32>
      %77 = vector.broadcast %76 : vector<1x1xf32> to vector<2x1xf32>
      %78 = tpu.concatenate %75, %59, %77 in 1 : vector<2x1xf32>, vector<2x1xf32>, vector<2x1xf32> -> vector<2x3xf32>
      %c0_33 = arith.constant 0 : index
      %c0_34 = arith.constant 0 : index
      %79 = vector.load %arg4[%c0_33, %c0_34] : memref<2x3xf32, #tpu.memory_space<vmem>>, vector<2x3xf32>
      tpu.vector_store %arg4[%c0_33, %c0_34], %78 {strides = array<i32>} : memref<2x3xf32, #tpu.memory_space<vmem>>, vector<2x3xf32>,
    } else {
    }
    return
  }
  func.func @transform_0(%arg0: i32) -> (i32, i32) {
    %c0_i32 = arith.constant 0 : i32
    %c0_i32_0 = arith.constant 0 : i32
    return %arg0, %c0_i32 : i32, i32
  }
  func.func @transform_1(%arg0: i32) -> (i32, i32) {
    %c0_i32 = arith.constant 0 : i32
    %c0_i32_0 = arith.constant 0 : i32
    return %c0_i32, %arg0 : i32, i32
  }
  func.func @transform_2(%arg0: i32) -> (i32, i32) {
    %c0_i32 = arith.constant 0 : i32
    %c0_i32_0 = arith.constant 0 : i32
    %c0_i32_1 = arith.constant 0 : i32
    return %c0_i32, %c0_i32_0 : i32, i32
  }
  func.func @transform_3(%arg0: i32) -> (i32, i32) {
    %c0_i32 = arith.constant 0 : i32
    %c0_i32_0 = arith.constant 0 : i32
    %c0_i32_1 = arith.constant 0 : i32
    return %c0_i32, %c0_i32_0 : i32, i32
  }
}

</mosaic_0001>

<bundles_post_ra>
// kernel: tpu_custom_call.1
= control target key start
LH: loop header
LB: loop body
LE: loop exit
PB: predicated region body
PF: predicated region fallthrough
CT: control target
= control target key end

     0   :  { %vm24_vm0 = vcmask 130048   ;;  %s754_s0 = inlined_call_operand.vmem [shape: f32[24,16], index: 0, kind: input, shape index: {}]   ;;  %s755_s1 = inlined_call_operand.vmem [shape: bf16[7,24], index: 1, kind: input, shape index: {}]   ;;  %s756_s2 = inlined_call_operand.vmem [shape: f32[2,6], index: 2, kind: input, shape index: {}]   ;;  %s757_s3 = inlined_call_operand.hbm [shape: f32[2,3], index: 3, kind: output, shape index: {}]  }
   0x1   :  { %v21_v0 = vld [vmem:[%s754_s0] sm:$0xff]  ;;  %v22_v1 = vld [vmem:[%s754_s0 + $0x8] sm:$0xff]  ;;  %v23_v2 = vld [vmem:[%s754_s0 + $0x10] sm:$0xff] }
   0x2   :  { %v25_v3 = vsel %vm24_vm0, %v21_v0, 0.0  ;;  %v31_v4 = vsel %vm24_vm0, %v23_v2, 0.0 }
   0x3   :  { %8 = vsyncpa [#allocation4], 0  ;;  %26 = vadd.xlane.f32.xlu0 %v25_v3  ;;  %32 = vadd.xlane.f32.xlu1 %v31_v4  ;;  %v28_v5 = vsel %vm24_vm0, %v22_v1, 0.0  ;;  %v639_v6 = vmov 0.0|0.0   ;;  %v640_v7 = vmov 0.0   ;;  %vm641_vm1 = vmmov 0  }
   0x4   :  { %599 = vmatprep.subr.bf16.mxu0 %v639_v6  ;;  %579 = vmatprep.subr.mxu1 %v640_v7  ;;  %vm19_vm2 = vcmask 22528   ;;  %vm40_vm3 = vcmask 7168   ;;  %vm44_vm4 = vcmask 15360   ;;  %v48_v22 = vld [vmem:[%s755_s1] sm:$0xf]  ;;  %vm51_vm5 = vcmask 195584  }
   0x5   :  { %576 = vmatprep.mubr.msk.f32.mxu0 %vm641_vm1, %v640_v7  ;;  %581 = vmatprep.mubr.msk.f32.mxu1 %vm641_vm1, %v640_v7  ;;  %20 = vst.msk [vmem:[#allocation2] sm:$0x7f] %vm19_vm2, %v640_v7  ;;  %v49_v24 = vunpack.c.l.bf16 %v48_v22  ;;  %vm144_vm6 = vcmask 1045504   ;;  %vm311_vm7 = vcmask 21520   ;;  %v699_v30 = vld [vmem:[%s756_s2] sm:$0x3] }
   0x6   :  { %vm140_vm8 = vcmask 48128   ;;  %s642_s20 = smov 126   ;;  %s643_s2 = smov 1   ;;  %vm425_vm9 = vcmask 1024   ;;  %vm295_vm10 = vcmask 5120   ;;  %vm303_vm11 = vcmask 13320  }
   0x7   :  { %29 = vadd.xlane.f32.xlu0 %v28_v5  ;;  %s644_s21 = smov 127   ;;  %s645_s22 = smov [#allocation3]   ;;  %vm533_vm12 = vcmask 17408  }
   0x8   :  { %s541_s23 = sshll.u32 %s645_s22, 4  ;;  %s542_s23 = int_to_ptr.vmem [resolvable:$true] %s541_s23 }
   0x9   :  { %s615_s24 = scalar_lea.vmem %s542_s23, 32  ;;  %p620_p1 = scmp.lt.s32.totalorder %s542_s23, %s542_s23 }
   0xa   :  { %p616_p0 = scmp.ne.s32.totalorder %s542_s23, %s615_s24  ;;  %p621_p2 = scmp.lt.s32.totalorder %s615_s24, %s615_s24 }
   0xc   :  { %v50_v26 = vld [vmem:[#allocation2] sm:$0x7f]  ;;  %p622_p3 = por %p621_p2, %p620_p1 }
   0xe   :  { %p623_p4 = pnand %p622_p3, %p616_p0 }
  0x90   :  { %v27_v8 = vpop.xlane.xlu0 %26  ;;  %v33_v10 = vpop.xlane.xlu1 %32 }
  0x91   :  { %v34_v9 = vmul.f32 0.0625, %v27_v8  ;;  %v36_v14 = vmul.f32 0.0625, %v33_v10 }
  0x93   :  { %v37_v11 = vmul.f32 %v34_v9, %v34_v9  ;;  %v39_v17 = vmul.f32 %v36_v14, %v36_v14 }
  0x94   :  { %v30_v12 = vpop.xlane.xlu0 %29 }
  0x95   :  { %v35_v13 = vmul.f32 0.0625, %v30_v12  ;;  %v41_v16 = vsel %vm40_vm3, %v34_v9, %v37_v11  ;;  %v43_v23 = vsel %vm40_vm3, %v36_v14, %v39_v17 }
  0x96   :  { %v45_v19 = vsel %vm44_vm4, %v41_v16, 1.0  ;;  %v47_v25 = vsel %vm44_vm4, %v43_v23, 1.0 }
  0x97   :  { %v38_v15 = vmul.f32 %v35_v13, %v35_v13 }
  0x99   :  { %v42_v18 = vsel %vm40_vm3, %v35_v13, %v38_v15 }
  0x9a   :  { %v46_v20 = vsel %vm44_vm4, %v42_v18, 1.0 }
  0x9b   :  { %v600_v21 = vpack.c.bf16 %v46_v20, %v45_v19 }
  0x9d   :  { %601 = vmatpush3.bf16.msra.mxu0 %v600_v21 }
  0x9e   :  { %574 = vmatprep.subr.mxu0 %v640_v7 }
  0xa1   :  { %575 = vmatpush3.msra.mxu0 %v47_v25 }
  0xa2   :  { %577 = vmatmul.mubr.msk.f32.vlgmr.msra.gmra.mrb[0].mxu0 %vm51_vm5, %v49_v24  ;;  %589 = vmatprep.subr.mxu0 %v640_v7 }
  0xa3   :  { %591 = vmatprep.mubr.msk.f32.mxu0 %vm641_vm1, %v640_v7 }
 0x175   :  { %v121_v27 = vpop.f32.mrb[0].mxu0 }
 0x176   :  { %v125_v28 = vadd.f32 %v121_v27, %v50_v26  ;;  %v578_v29 = vpop.f32.mrb[1].mxu0 }
 0x178   :  { %127 = vst.msk [vmem:[#allocation2] sm:$0x7f] %vm19_vm2, %v125_v28 }
 0x17f   :  { %v701_v31 = vld [vmem:[#allocation2] sm:$0x7f] }
 0x180   :  { %218 = vrot.lane.b32.xlu1 %v701_v31, %s642_s20  ;;  %580 = vmatpush3.msk.msra.mxu1 %vm144_vm6, %v701_v31  ;;  %v133_v32 = vmax.f32 %v701_v31, 1.0  ;;  %v312_v33 = vsel %vm311_vm7, %v701_v31, 0.0  ;;  %v296_v9 = vsel %vm295_vm10, %v701_v31, 0.0  ;;  %v304_v29 = vsel %vm303_vm11, %v701_v31, 0.0 }
 0x181   :  { %v313_v34 = vrot.slane %v312_v33, 4  ;;  %582 = vmatmul.mubr.msk.f32.vlgmr.msra.gmra.mrb[0].mxu1 %vm140_vm8, %v699_v30  ;;  %584 = vmatprep.subr.mxu1 %v640_v7  ;;  %v297_v13 = vrot.slane %v296_v9, 4 }
 0x182   :  { %135 = vrot.lane.b32.xlu0 %v133_v32, %s642_s20  ;;  %586 = vmatprep.mubr.msk.f32.mxu1 %vm641_vm1, %v640_v7  ;;  %v305_v32 = vrot.slane %v304_v29, 4 }
 0x183   :  { %v314_v35 = vadd.f32 %v313_v34, %v312_v33  ;;  %v298_v16 = vadd.f32 %v297_v13, %v296_v9 }
 0x184   :  { %v306_v33 = vadd.f32 %v305_v32, %v304_v29 }
 0x185   :  { %v315_v36 = vrot.slane %v314_v35, 2  ;;  %v299_v17 = vrot.slane %v298_v16, 2 }
 0x187   :  { %v316_v37 = vadd.f32 %v315_v36, %v314_v35  ;;  %v300_v19 = vadd.f32 %v299_v17, %v298_v16  ;;  %v519_v36 = vlaneseq }
 0x189   :  { %v317_v38 = vrot.slane %v316_v37, 1  ;;  %v301_v21 = vrot.slane %v300_v19, 1 }
 0x18b   :  { %v318_v39 = vadd.f32 %v317_v38, %v316_v37  ;;  %v302_v22 = vadd.f32 %v301_v21, %v300_v19  ;;  %v520_v38 = vshrl.u32 %v519_v36, 7 }
 0x18d   :  { %v321_v40 = vsub.f32 %v701_v31, %v318_v39  ;;  %v319_v23 = vsub.f32 %v701_v31, %v302_v22 }
 0x18f   :  { %331 = vrot.lane.b32.xlu0 %v321_v40, %s642_s20  ;;  %v322_v52 = vmax.f32 %v321_v40, 1.0 }
 0x1f2   :  { %v219_v41 = vpop.permute.xlu1 %218 }
 0x1f3   :  { %585 = vmatpush3.msk.msra.mxu1 %vm144_vm6, %v219_v41 }
 0x1f4   :  { %587 = vmatmul.mubr.msk.f32.vlgmr.msra.gmra.mrb[2].mxu1 %vm140_vm8, %v699_v30  ;;  %v136_v42 = vpop.permute.xlu0 %135  ;;  %594 = vmatprep.subr.mxu1 %v640_v7 }
 0x1f5   :  { %609 = vrcp.f32 %v136_v42  ;;  %596 = vmatprep.mubr.msk.f32.mxu1 %vm641_vm1, %v640_v7 }
 0x1ff   :  { %v610_v43 = vpop.eup %609 }
 0x200   :  { %v139_v44 = vmul.f32 %v610_v43, %v701_v31 }
 0x201   :  { %v332_v27 = vpop.permute.xlu0 %331 }
 0x202   :  { %v341_v45 = vmul.f32 %v139_v44, %v139_v44  ;;  %v441_v4 = vmul.f32 2.0, %v139_v44 }
 0x204   :  { %v343_v46 = vmul.f32 %v341_v45, %v219_v41  ;;  %v442_v10 = vmul.f32 %v441_v4, %v139_v44  ;;  %v521_v41 = vsub.s32 6, %v520_v38 }
 0x206   :  { %345 = vrot.lane.b32.xlu1 %v343_v46, %s643_s2 }
 0x254   :  { %v214_v47 = vpop.f32.mrb[0].mxu1 }
 0x255   :  { %v583_v48 = vpop.f32.mrb[1].mxu1 }
 0x278   :  { %v346_v49 = vpop.permute.xlu1 %345 }
 0x279   :  { %v348_v50 = vsub.f32 %v701_v31, %v346_v49 }
 0x27b   :  { %v349_v51 = vmax.f32 %v348_v50, 0.0 }
 0x27d   :  { %351 = vrot.lane.b32.xlu1 %v349_v51, %s644_s21 }
 0x281   :  { %324 = vrot.lane.b32.xlu1 %v322_v52, %s642_s20 }
 0x2c7   :  { %v288_v53 = vpop.f32.mrb[2].mxu1 }
 0x2c8   :  { %v292_v54 = vmax.f32 %v288_v53, 1.0  ;;  %v588_v55 = vpop.f32.mrb[3].mxu1 }
 0x2ca   :  { %611 = vrcp.f32 %v292_v54 }
 0x2d4   :  { %v612_v56 = vpop.eup %611 }
 0x2d5   :  { %v294_v57 = vmul.f32 %v612_v56, %v214_v47 }
 0x2d7   :  { %v426_v58 = vsel %vm425_vm9, %v294_v57, 0.0  ;;  %v433_v59 = vmul.f32 %v294_v57, %v294_v57 }
 0x2d8   :  { %v427_v60 = vrot.slane %v426_v58, 4 }
 0x2d9   :  { %v434_v61 = vsel %vm425_vm9, %v433_v59, 0.0 }
 0x2da   :  { %v428_v62 = vadd.f32 %v427_v60, %v426_v58  ;;  %v435_v63 = vrot.slane %v434_v61, 4 }
 0x2dc   :  { %v429_v0 = vrot.slane %v428_v62, 2  ;;  %v436_v1 = vadd.f32 %v435_v63, %v434_v61 }
 0x2de   :  { %v430_v2 = vadd.f32 %v429_v0, %v428_v62  ;;  %v437_v3 = vrot.slane %v436_v1, 2 }
 0x2e0   :  { %v431_v5 = vrot.slane %v430_v2, 1  ;;  %v438_v6 = vadd.f32 %v437_v3, %v436_v1 }
 0x2e2   :  { %v432_v7 = vadd.f32 %v431_v5, %v430_v2  ;;  %v439_v8 = vrot.slane %v438_v6, 1 }
 0x2e4   :  { %v440_v11 = vadd.f32 %v439_v8, %v438_v6  ;;  %v443_v12 = vmul.f32 %v441_v4, %v432_v7 }
 0x2e6   :  { %v444_v14 = vsub.f32 %v442_v10, %v443_v12 }
 0x2e8   :  { %v445_v15 = vadd.f32 %v444_v14, %v440_v11 }
 0x2ea   :  { %595 = vmatpush3.msk.msra.mxu1 %vm144_vm6, %v445_v15 }
 0x2eb   :  { %597 = vmatmul.mubr.msk.f32.vlgmr.msra.gmra.mrb[4].mxu1 %vm140_vm8, %v699_v30 }
 0x2ef   :  { %v352_v18 = vpop.permute.xlu1 %351 }
 0x2f0   :  { %590 = vmatpush3.msk.msra.mxu0 %vm144_vm6, %v352_v18 }
 0x2f1   :  { %592 = vmatmul.mubr.msk.f32.vlgmr.msra.gmra.mrb[2].mxu0 %vm140_vm8, %v699_v30  ;;  %v307_v30 = vrot.slane %v306_v33, 2 }
 0x2f3   :  { %v325_v20 = vpop.permute.xlu1 %324  ;;  %v308_v34 = vadd.f32 %v307_v30, %v306_v33 }
 0x2f4   :  { %613 = vrcp.f32 %v325_v20 }
 0x2f5   :  { %v309_v35 = vrot.slane %v308_v34, 1 }
 0x2f7   :  { %v310_v37 = vadd.f32 %v309_v35, %v308_v34 }
 0x2f9   :  { %v320_v39 = vsub.f32 %v701_v31, %v310_v37 }
 0x2fe   :  { %v614_v24 = vpop.eup %613 }
 0x2ff   :  { %v328_v25 = vmul.f32 %v614_v24, %v319_v23 }
 0x301   :  { %v329_v26 = vmul.f32 %v328_v25, %v328_v25 }
 0x303   :  { %v334_v28 = vmul.f32 %v332_v27, %v329_v26 }
 0x305   :  { %336 = vrot.lane.b32.xlu1 %v334_v28, %s643_s2 }
 0x377   :  { %v337_v40 = vpop.permute.xlu1 %336 }
 0x378   :  { %v339_v42 = vsub.f32 %v320_v39, %v337_v40 }
 0x37a   :  { %v340_v43 = vmax.f32 %v339_v42, 0.0 }
 0x37c   :  { %v522_v44 = vrot.slane %v340_v43, %v521_v41 }
 0x37e   :  { %528 = vrot.lane.b32.xlu1 %v522_v44, %s643_s2 }
 0x3be   :  { %v515_v45 = vpop.f32.mrb[4].mxu1 }
 0x3bf   :  { %v598_v46 = vpop.f32.mrb[5].mxu1 }
 0x3c4   :  { %v421_v47 = vpop.f32.mrb[2].mxu0 }
 0x3c5   :  { %524 = vrot.lane.b32.xlu0 %v421_v47, %s643_s2  ;;  %v593_v48 = vpop.f32.mrb[3].mxu0 }
 0x3f0   :  { %v529_v50 = vpop.permute.xlu1 %528 }
 0x437   :  { %v525_v49 = vpop.permute.xlu0 %524 }
 0x438   :  { %v531_v31 = vsel %vm40_vm3, %v515_v45, %v525_v49 }
 0x439   :  { %v532_v51 = vsel %vm44_vm4, %v531_v31, %v529_v50 }
 0x43a   :  { %534 = vst.msk [vmem:[#allocation3] sm:$0x3] %vm533_vm12, %v532_v51 }
 0x43b   :  { %626 = shalt.err (!%p623_p4)
}
 0x43c   :  { %s627_s27 = scalar_lea.hbm %s757_s3, 32 }
 0x43d   :  { %p628_p5 = scmp.ne.s32.totalorder %s757_s3, %s627_s27  ;;  %p631_p6 = scmp.lt.u32.totalorder %s627_s27, %s757_s3 }
 0x43f   :  { %p633_p7 = pnand %p631_p6, %p628_p5 }
 0x441   :  { %636 = shalt.err (!%p633_p7)
}
 0x442   :  { %544 = dma.vmem_to_hbm [thread:$0]  %s542_s23, 32, %s757_s3, [#allocation4]  }
 0x443   :  { %637 = dma.done.wait [#allocation4], 32  }
 0x444   :  { %638 = vsyncadd [#allocation4], 4294967264 }
 0x445   :  { %548 = vsyncpa [#allocation4], 1 }

</bundles_post_ra>
